<compile_context>
chip_gen: v7x
topology: tpu7x:2x2x1
jax: 0.10.0
libtpu: 0.0.40
codegen_flags: <defaults>
</compile_context>

<pallas_src>
import functools

import jax
import jax.numpy as jnp
from jax.experimental import pallas as pl
from jax.experimental.pallas import tpu as pltpu


def _adjust_kernel(params_ref, x_ref, o_ref):
    # params_ref: (2,) f32 in SMEM -> [eff_scale, eff_bias]; loop-invariant.
    s = params_ref[0]
    b = params_ref[1]
    o_ref[...] = (x_ref[...].astype(jnp.float32) * s + b).astype(o_ref.dtype)


def _roundup(v, m):
    return ((v + m - 1) // m) * m


def adjust_layer(x, scale, bias, base=1, donate_x=False):
    """Pallas implementation of AdjustLayer.forward.

    Args:
      x: jnp array of any shape (e.g. NCHW feature tensor).
      scale, bias: shape-(1,) float32 parameters.
      base: python int/float (static), matches the PyTorch `base` attribute.
      donate_x: if the caller can donate x's buffer, alias it to the output.
    """
    x = jnp.asarray(x)
    if not jnp.issubdtype(x.dtype, jnp.floating):
        # PyTorch promotes integer inputs when multiplied by float params.
        x = x.astype(jnp.float32)
    orig_shape = x.shape
    dtype = x.dtype

    # Effective scalar affine params (glue, plain JAX, computed once).
    s = jnp.reshape(scale, ()).astype(jnp.float32)
    b = jnp.reshape(bias, ()).astype(jnp.float32)
    if base == 1:
        eff_scale, eff_bias = s, b
    else:
        eff_scale = jnp.float32(base) ** s
        eff_bias = jnp.float32(base) ** b - jnp.float32(1.0)
    params = jnp.stack([eff_scale, eff_bias])  # (2,) f32 -> SMEM

    n = x.size
    if n == 0:
        return x
    flat = x.reshape(-1)

    LANE = 128
    n_aligned = (n // LANE) * LANE
    rem = n - n_aligned

    if n_aligned == 0:
        # Entire array is smaller than one lane row; plain jnp is optimal.
        return (flat.astype(jnp.float32) * eff_scale + eff_bias).astype(dtype).reshape(orig_shape)

    # Aligned prefix only (reshape is free; no pad copy).
    x2d = (flat[:n_aligned] if rem else flat).reshape(-1, LANE)
    rows = x2d.shape[0]

    itemsize = jnp.dtype(dtype).itemsize
    sub = max(8, 32 // max(itemsize, 1))  # sublane granularity per dtype

    # Generation-aware tile bytes: conservative (2 MiB) on v5-class and older
    # chips (16 MiB scoped-VMEM default), 4 MiB on v6e / v7x.
    kind = jax.devices()[0].device_kind.lower()
    conservative = any(tag in kind for tag in ("v2", "v3", "v4", "v5"))
    tile_bytes = (2 << 20) if conservative else (4 << 20)
    max_block_rows = max(sub, (tile_bytes // (LANE * itemsize)) // sub * sub)

    # Ensure at least 2 grid steps for medium tensors so the "parallel" axis
    # shards across both v7x TensorCores; large tensors take full-size blocks.
    half_rows = _roundup(pl.cdiv(rows, 2), sub)
    block_rows = min(max_block_rows, max(sub, half_rows))
    grid = (pl.cdiv(rows, block_rows),)

    cost = pl.CostEstimate(
        flops=2 * n_aligned,
        transcendentals=0,
        bytes_accessed=2 * n_aligned * itemsize,
    )

    out2d = pl.pallas_call(
        _adjust_kernel,
        out_shape=jax.ShapeDtypeStruct((rows, LANE), dtype),
        grid=grid,
        in_specs=[
            pl.BlockSpec(memory_space=pltpu.MemorySpace.SMEM),   # (2,) params
            pl.BlockSpec((block_rows, LANE), lambda i: (i, 0)),  # x tile
        ],
        out_specs=pl.BlockSpec((block_rows, LANE), lambda i: (i, 0)),
        compiler_params=pltpu.CompilerParams(
            dimension_semantics=("parallel",),
        ),
        cost_estimate=cost,
        input_output_aliases=({1: 0} if donate_x else {}),
    )(params, x2d)

    out_flat = out2d.reshape(-1)
    if rem:
        # <=127-element tail handled in plain jnp (tiny; avoids pad/slice of
        # the full array).
        tail = (flat[n_aligned:].astype(jnp.float32) * eff_scale + eff_bias).astype(dtype)
        out_flat = jnp.concatenate([out_flat, tail])
    return out_flat.reshape(orig_shape)


if __name__ == "__main__":
    # Matches AdjustLayer(init_scale=1e-4, init_bias=0)
    init_scale = 1e-4
    init_bias = 0.0
    scale = jnp.array([init_scale], dtype=jnp.float32)
    bias = jnp.array([init_bias], dtype=jnp.float32)

    key = jax.random.PRNGKey(0)
    x = jax.random.normal(key, (2, 4, 16, 16), dtype=jnp.float32)  # NCHW features

    # base == 1 branch (module default)
    fn1 = jax.jit(functools.partial(adjust_layer, base=1))
    y1 = jax.block_until_ready(fn1(x, scale, bias))
    ref1 = x * scale[0] + bias[0]
    assert y1.shape == x.shape and y1.dtype == x.dtype
    assert jnp.max(jnp.abs(y1 - ref1)) < 1e-6

    # base != 1 branch
    base = 20
    fn2 = jax.jit(functools.partial(adjust_layer, base=base))
    y2 = jax.block_until_ready(fn2(x, scale, bias))
    ref2 = x * (jnp.float32(base) ** scale[0]) + (jnp.float32(base) ** bias[0]) - 1.0
    assert jnp.max(jnp.abs(y2 - ref2)) < 1e-5

    # Unaligned size (exercises the aligned-prefix + jnp-tail path, no pad/slice copies)
    key2 = jax.random.PRNGKey(1)
    x3 = jax.random.normal(key2, (5, 67), dtype=jnp.float32)  # 335 elems -> 256 + 79 tail
    y3 = jax.block_until_ready(fn1(x3, scale, bias))
    ref3 = x3 * scale[0] + bias[0]
    assert y3.shape == x3.shape
    assert jnp.max(jnp.abs(y3 - ref3)) < 1e-6

    print("KERNEL_OK")
</pallas_src>

<mosaic_0001>
module attributes {stable_mosaic.version = 11 : i64} {
  func.func @_adjust_kernel(%arg0: i32, %arg1: memref<2xf32, #tpu.memory_space<smem>>, %arg2: memref<8x128xf32, #tpu.memory_space<vmem>>, %arg3: memref<8x128xf32, #tpu.memory_space<vmem>>) attributes {dimension_semantics = [#tpu.dimension_semantics<parallel>], iteration_bounds = array<i64: 2>, scalar_prefetch = 0 : i64, scratch_operands = 0 : i64, tpu.core_type = #tpu.core_type<tc>, window_params = [{transform_indices = @transform_0, window_bounds = array<i64: 2>}, {transform_indices = @transform_1, window_bounds = array<i64: 8, 128>}, {transform_indices = @transform_2, window_bounds = array<i64: 8, 128>}]} {
    %c0 = arith.constant 0 : index
    %0 = memref.load %arg1[%c0] : memref<2xf32, #tpu.memory_space<smem>>
    %c1 = arith.constant 1 : index
    %1 = memref.load %arg1[%c1] : memref<2xf32, #tpu.memory_space<smem>>
    %c0_0 = arith.constant 0 : index
    %c0_1 = arith.constant 0 : index
    %2 = vector.load %arg2[%c0_0, %c0_1] : memref<8x128xf32, #tpu.memory_space<vmem>>, vector<8x128xf32>
    %3 = vector.broadcast %0 : f32 to vector<8x128xf32>
    %4 = arith.mulf %2, %3 : vector<8x128xf32>
    %5 = vector.broadcast %1 : f32 to vector<8x128xf32>
    %6 = arith.addf %4, %5 : vector<8x128xf32>
    %c0_2 = arith.constant 0 : index
    %c0_3 = arith.constant 0 : index
    %7 = vector.load %arg3[%c0_2, %c0_3] : memref<8x128xf32, #tpu.memory_space<vmem>>, vector<8x128xf32>
    tpu.vector_store %arg3[%c0_2, %c0_3], %6 {strides = array<i32>} : memref<8x128xf32, #tpu.memory_space<vmem>>, vector<8x128xf32>,
    return
  }
  func.func @transform_0(%arg0: i32) -> i32 {
    %c0_i32 = arith.constant 0 : i32
    %c0_i32_0 = arith.constant 0 : i32
    return %c0_i32 : i32
  }
  func.func @transform_1(%arg0: i32) -> (i32, i32) {
    %c0_i32 = arith.constant 0 : i32
    %c0_i32_0 = arith.constant 0 : i32
    return %arg0, %c0_i32 : i32, i32
  }
  func.func @transform_2(%arg0: i32) -> (i32, i32) {
    %c0_i32 = arith.constant 0 : i32
    %c0_i32_0 = arith.constant 0 : i32
    return %arg0, %c0_i32 : i32, i32
  }
}

</mosaic_0001>

<bundles_post_ra>
// kernel: adjust_layer.1
= control target key start
LH: loop header
LB: loop body
LE: loop exit
PB: predicated region body
PF: predicated region fallthrough
CT: control target
= control target key end

     0   :  { %7 = vsyncpa [#allocation3], 0  ;;  %s300_s9 = smov 0   ;;  %s331_s0 = inlined_call_operand.vmem [shape: f32[2], index: 0, kind: input, shape index: {}]   ;;  %s332_s1 = inlined_call_operand.vmem [shape: f32[16,128], index: 1, kind: input, shape index: {}]   ;;  %s333_s2 = inlined_call_operand.vmem [shape: f32[16,128], index: 2, kind: output, shape index: {}]  }
   0x1 LB: > { %s226_s10 = sadd.s32 4294967295, %s282_s9   ;;  %p228_p0 = scmp.ge.s32.totalorder %s282_s9, 1  ;;  %s282_s9 = sphi %s300_s9, %s13_s9  }
   0x2   : > { %p91_p1 = scmp.lt.s32.totalorder %s282_s9, 3  ;;  %s104_s13 = sshll.u32 %s331_s0, 4  ;;  %s105_s13 = int_to_ptr.vmem [resolvable:$true] %s104_s13 }
   0x3   : > { %p246_p3 = scmp.eq.s32.totalorder %s226_s10, 0  ;;  %s257_s15 = scalar_lea.vmem %s105_s13, 16 }
   0x4   : > { %p311_p2 = pnand %p228_p0, %p91_p1  ;;  %p258_p6 = scmp.ne.s32.totalorder %s105_s13, %s257_s15 }
   0x5   : > { %p265_p10 = scmp.lt.s32.totalorder %s105_s13, %s105_s13  ;;  %p266_p11 = scmp.lt.s32.totalorder %s257_s15, %s257_s15 }
   0x6   : > { %p242_p4 = pneg %p311_p2 }
   0x7   : > { %p267_p12 = por %p266_p11, %p265_p10 }
   0x8   : > { %p243_p5 = pnand %p246_p3, %p242_p4 }
   0xa   : > { %p259_p7 = pneg %p243_p5 }
   0xc   : > { %p260_p8 = pnand %p259_p7, %p258_p6 }
   0xe   : > { %p261_p9 = pneg %p260_p8 }
  0x10   : > { %p268_p13 = pnand %p267_p12, %p261_p9 }
  0x12   : > { %271 = shalt.err (!%p268_p13)
}
  0x13   : > { %s284_s16 = smov [#allocation2]   ;;  %124 = sbr.rel (%p311_p2) target bundleno = 41 (0x29), region = 28 }
  0x14   : > { %245 = dma.vmem_to_smem (!%p243_p5), %s105_s13, 16, %s284_s16, [#allocation3]  }
  0x1a   : > { %277 = dma.done.wait (%p246_p3), [#allocation3], 16  }
  0x1b   : > { %279 = vsyncadd (%p246_p3), [#allocation3], 4294967280 }
  0x1c   : > { %130 = sfence }
  0x1d   : > { %p145_p0 = scmp.lt.s32.totalorder %s226_s10, 1  ;;  %s153_s17 = sld [smem:[#allocation2]] }
  0x1e   : > { %s235_s18 = sld [smem:[#allocation2 + $0x1]] }
  0x1f   : > { %s336_s10 = smov (!%p145_p0, %s226_s10), 1 }
  0x20   : > { %s233_s19 = sshll.u32 %s336_s10, 3 }
  0x21   : > { %s148_s22 = scalar_lea.vmem %s332_s1, %s233_s19  ;;  %s152_s25 = scalar_lea.vmem %s333_s2, %s233_s19 }
  0x22   : > { %v155_v0 = vld [vmem:[%s148_s22] sm:$0xff] }
  0x23   : > { %v156_v1 = vstv %s153_s17 }
  0x24   : > { %v157_v2 = vmul.f32 %v156_v1, %v155_v0  ;;  %v158_v3 = vstv %s235_s18 }
  0x26   : > { %v159_v4 = vadd.f32 %v158_v3, %v157_v2 }
  0x28   : > { %160 = vst [vmem:[%s152_s25] sm:$0xff] %v159_v4 }
  0x29 PF: > { %s13_s9 = sadd.s32 1, %s282_s9  }
  0x2a   : > { %p10_p1 = scmp.ge.s32.totalorder %s13_s9, 4  }
  0x2c   :  { %12 = sbr.rel (!%p10_p1) target bundleno = 1 (0x1), region = 63 }
  0x33   :  { %180 = vsyncpa [#allocation3], 1 }
  0x34   :  { %182 = vsyncpa [#allocation3 + $0x1], 1 }

</bundles_post_ra>
